<compile_context>
chip_gen: v5e
topology: v5e:2x2
jax: 0.10.0
libtpu: 0.0.40
codegen_flags: <defaults>
</compile_context>

<pallas_src>
import jax
import jax.numpy as jnp
from jax.experimental import pallas as pl
from jax.experimental.pallas import tpu as pltpu


def _round_up(x, m):
    return ((x + m - 1) // m) * m


def _mlp_softmax_kernel(x_ref, w1_ref, b1_ref, w2_ref, b2_ref, out_ref):
    # One batch tile per grid step. Weights/biases are VMEM-resident (same block every
    # step). bf16 matmul operands, f32 accumulation; element-wise math in f32.
    x = x_ref[...].astype(jnp.bfloat16)

    # linear1 + ReLU
    h = jnp.dot(x, w1_ref[...], preferred_element_type=jnp.float32) + b1_ref[...]
    h = jnp.maximum(h, 0.0)

    # linear2 (unpadded class axis: O equals the full array dim, so a narrow store is legal)
    logits = (
        jnp.dot(h.astype(jnp.bfloat16), w2_ref[...], preferred_element_type=jnp.float32)
        + b2_ref[...]
    )

    # softmax over dim=1 (class axis), exact normalization
    m = jnp.max(logits, axis=-1, keepdims=True)
    e = jnp.exp(logits - m)
    denom = jnp.sum(e, axis=-1, keepdims=True)
    out_ref[...] = (e / denom).astype(out_ref.dtype)


def prepare_params(w1, b1, w2, b2):
    """One-time parameter prep (bf16 MXU operands; biases stay f32).
    w1: (input, hidden); b1: (1, hidden); w2: (hidden, output); b2: (1, output)."""
    return (
        w1.astype(jnp.bfloat16),
        b1.astype(jnp.float32),
        w2.astype(jnp.bfloat16),
        b2.astype(jnp.float32),
    )


def torch_model_forward(x, params, *, tb_max=4096):
    """x: (B, input_size) f32; params from prepare_params().
    Returns softmax probabilities (B, output_size), f32."""
    w1b, b1, w2b, b2 = params
    B, F = x.shape
    H = w1b.shape[1]
    O = w2b.shape[1]

    # Batch tile: aim for >=4 grid steps when B is large enough (v7x megacore sharding
    # + pipelining on all gens), cap at tb_max, keep it sublane-aligned (multiple of 8)
    # or equal to the full batch when B is tiny.
    TB = max(1, min(B, min(tb_max, _round_up(pl.cdiv(B, 4), 8))))
    nb = pl.cdiv(B, TB)

    cost = pl.CostEstimate(
        flops=int(2 * B * (F * H + H * O)),
        transcendentals=int(B * O),
        bytes_accessed=int(
            B * F * x.dtype.itemsize          # x stream
            + B * O * 4                        # output writeback (f32)
            + w1b.size * 2 + w2b.size * 2      # bf16 weights
            + b1.size * 4 + b2.size * 4        # f32 biases
        ),
    )

    out = pl.pallas_call(
        _mlp_softmax_kernel,
        out_shape=jax.ShapeDtypeStruct((B, O), jnp.float32),
        grid_spec=pltpu.PrefetchScalarGridSpec(
            num_scalar_prefetch=0,
            grid=(nb,),
            in_specs=[
                pl.BlockSpec((TB, F), lambda i: (i, 0)),   # x: tiled over batch
                pl.BlockSpec((F, H), lambda i: (0, 0)),    # w1: resident
                pl.BlockSpec((1, H), lambda i: (0, 0)),    # b1: resident
                pl.BlockSpec((H, O), lambda i: (0, 0)),    # w2: resident
                pl.BlockSpec((1, O), lambda i: (0, 0)),    # b2: resident
            ],
            out_specs=pl.BlockSpec((TB, O), lambda i: (i, 0)),
        ),
        compiler_params=pltpu.CompilerParams(
            dimension_semantics=("parallel",),
        ),
        cost_estimate=cost,
    )(x, w1b, b1, w2b, b2)

    return out


if __name__ == "__main__":
    # Small shapes consistent with the module's forward (2-D Linear input).
    batch = 8
    input_size = 32
    hidden_size = 64
    output_size = 16

    key = jax.random.PRNGKey(0)
    kx, k1, k2, k3, k4 = jax.random.split(key, 5)

    x = jax.random.normal(kx, (batch, input_size), dtype=jnp.float32)

    # Deterministic parameter init (roughly matching nn.Linear's uniform scale).
    lim1 = 1.0 / (input_size ** 0.5)
    lim2 = 1.0 / (hidden_size ** 0.5)
    w1 = jax.random.uniform(k1, (input_size, hidden_size), jnp.float32, -lim1, lim1)
    b1 = jax.random.uniform(k2, (1, hidden_size), jnp.float32, -lim1, lim1)
    w2 = jax.random.uniform(k3, (hidden_size, output_size), jnp.float32, -lim2, lim2)
    b2 = jax.random.uniform(k4, (1, output_size), jnp.float32, -lim2, lim2)

    params = prepare_params(w1, b1, w2, b2)   # hoisted, one-time
    y_pred = torch_model_forward(x, params)
    jax.block_until_ready(y_pred)

    # Reference check in plain f32 JAX (kernel uses bf16 MXU operands with f32
    # accumulation, so tolerance is loosened accordingly).
    h_ref = jnp.maximum(x @ w1 + b1, 0.0)
    logits_ref = h_ref @ w2 + b2
    probs_ref = jax.nn.softmax(logits_ref, axis=1)

    assert y_pred.shape == (batch, output_size)
    assert jnp.allclose(y_pred, probs_ref, atol=2e-2, rtol=2e-2)
    assert jnp.allclose(jnp.sum(y_pred, axis=1), 1.0, atol=1e-3)

    print("KERNEL_OK")
</pallas_src>

<mosaic_0001>
module attributes {stable_mosaic.version = 11 : i64} {
  func.func @_mlp_softmax_kernel(%arg0: i32, %arg1: memref<8x32xf32, #tpu.memory_space<vmem>>, %arg2: memref<32x64xbf16, #tpu.memory_space<vmem>>, %arg3: memref<1x64xf32, #tpu.memory_space<vmem>>, %arg4: memref<64x16xbf16, #tpu.memory_space<vmem>>, %arg5: memref<1x16xf32, #tpu.memory_space<vmem>>, %arg6: memref<8x16xf32, #tpu.memory_space<vmem>>) attributes {dimension_semantics = [#tpu.dimension_semantics<parallel>], iteration_bounds = array<i64: 1>, scalar_prefetch = 0 : i64, scratch_operands = 0 : i64, tpu.core_type = #tpu.core_type<tc>, window_params = [{transform_indices = @transform_0, window_bounds = array<i64: 8, 32>}, {pipeline_mode = #tpu.pipeline_mode<synchronous>, transform_indices = @transform_1, window_bounds = array<i64: 32, 64>}, {pipeline_mode = #tpu.pipeline_mode<synchronous>, transform_indices = @transform_2, window_bounds = array<i64: 1, 64>}, {pipeline_mode = #tpu.pipeline_mode<synchronous>, transform_indices = @transform_3, window_bounds = array<i64: 64, 16>}, {pipeline_mode = #tpu.pipeline_mode<synchronous>, transform_indices = @transform_4, window_bounds = array<i64: 1, 16>}, {transform_indices = @transform_5, window_bounds = array<i64: 8, 16>}]} {
    %c0 = arith.constant 0 : index
    %c0_0 = arith.constant 0 : index
    %0 = vector.load %arg1[%c0, %c0_0] : memref<8x32xf32, #tpu.memory_space<vmem>>, vector<8x32xf32>
    %1 = arith.truncf %0 : vector<8x32xf32> to vector<8x32xbf16>
    %c0_1 = arith.constant 0 : index
    %c0_2 = arith.constant 0 : index
    %2 = vector.load %arg2[%c0_1, %c0_2] : memref<32x64xbf16, #tpu.memory_space<vmem>>, vector<32x64xbf16>
    %cst = arith.constant dense<0.000000e+00> : vector<8x64xf32>
    %3 = tpu.matmul %1, %2, %cst {dimension_numbers = #tpu.dot_dimension_numbers<[1], [0], [0], [1], [0, 0, 1, 1], [], []>} : vector<8x32xbf16>, vector<32x64xbf16>, vector<8x64xf32> -> vector<8x64xf32>
    %c0_3 = arith.constant 0 : index
    %c0_4 = arith.constant 0 : index
    %4 = vector.load %arg3[%c0_3, %c0_4] : memref<1x64xf32, #tpu.memory_space<vmem>>, vector<1x64xf32>
    %5 = vector.broadcast %4 : vector<1x64xf32> to vector<8x64xf32>
    %6 = arith.addf %3, %5 : vector<8x64xf32>
    %cst_5 = arith.constant 0.000000e+00 : f32
    %7 = vector.broadcast %cst_5 : f32 to vector<8x64xf32>
    %8 = arith.maximumf %6, %7 : vector<8x64xf32>
    %9 = arith.truncf %8 : vector<8x64xf32> to vector<8x64xbf16>
    %c0_6 = arith.constant 0 : index
    %c0_7 = arith.constant 0 : index
    %10 = vector.load %arg4[%c0_6, %c0_7] : memref<64x16xbf16, #tpu.memory_space<vmem>>, vector<64x16xbf16>
    %cst_8 = arith.constant dense<0.000000e+00> : vector<8x16xf32>
    %11 = tpu.matmul %9, %10, %cst_8 {dimension_numbers = #tpu.dot_dimension_numbers<[1], [0], [0], [1], [0, 0, 1, 1], [], []>} : vector<8x64xbf16>, vector<64x16xbf16>, vector<8x16xf32> -> vector<8x16xf32>
    %c0_9 = arith.constant 0 : index
    %c0_10 = arith.constant 0 : index
    %12 = vector.load %arg5[%c0_9, %c0_10] : memref<1x16xf32, #tpu.memory_space<vmem>>, vector<1x16xf32>
    %13 = vector.broadcast %12 : vector<1x16xf32> to vector<8x16xf32>
    %14 = arith.addf %11, %13 : vector<8x16xf32>
    %cst_11 = arith.constant dense<0xFF800000> : vector<8xf32>
    %15 = vector.multi_reduction <maximumf>, %14, %cst_11 [1] : vector<8x16xf32> to vector<8xf32>
    %16 = vector.shape_cast %15 : vector<8xf32> to vector<8x1xf32>
    %17 = vector.broadcast %16 : vector<8x1xf32> to vector<8x16xf32>
    %18 = arith.subf %14, %17 : vector<8x16xf32>
    %19 = math.exp %18 : vector<8x16xf32>
    %cst_12 = arith.constant dense<0.000000e+00> : vector<8xf32>
    %20 = vector.multi_reduction <add>, %19, %cst_12 [1] : vector<8x16xf32> to vector<8xf32>
    %21 = vector.shape_cast %20 : vector<8xf32> to vector<8x1xf32>
    %22 = vector.broadcast %21 : vector<8x1xf32> to vector<8x16xf32>
    %23 = arith.divf %19, %22 : vector<8x16xf32>
    %c0_13 = arith.constant 0 : index
    %c0_14 = arith.constant 0 : index
    %24 = vector.load %arg6[%c0_13, %c0_14] : memref<8x16xf32, #tpu.memory_space<vmem>>, vector<8x16xf32>
    tpu.vector_store %arg6[%c0_13, %c0_14], %23 {strides = array<i32>} : memref<8x16xf32, #tpu.memory_space<vmem>>, vector<8x16xf32>,
    return
  }
  func.func @transform_0(%arg0: i32) -> (i32, i32) {
    %c0_i32 = arith.constant 0 : i32
    %c0_i32_0 = arith.constant 0 : i32
    return %arg0, %c0_i32 : i32, i32
  }
  func.func @transform_1(%arg0: i32) -> (i32, i32) {
    %c0_i32 = arith.constant 0 : i32
    %c0_i32_0 = arith.constant 0 : i32
    %c0_i32_1 = arith.constant 0 : i32
    return %c0_i32, %c0_i32_0 : i32, i32
  }
  func.func @transform_2(%arg0: i32) -> (i32, i32) {
    %c0_i32 = arith.constant 0 : i32
    %c0_i32_0 = arith.constant 0 : i32
    %c0_i32_1 = arith.constant 0 : i32
    return %c0_i32, %c0_i32_0 : i32, i32
  }
  func.func @transform_3(%arg0: i32) -> (i32, i32) {
    %c0_i32 = arith.constant 0 : i32
    %c0_i32_0 = arith.constant 0 : i32
    %c0_i32_1 = arith.constant 0 : i32
    return %c0_i32, %c0_i32_0 : i32, i32
  }
  func.func @transform_4(%arg0: i32) -> (i32, i32) {
    %c0_i32 = arith.constant 0 : i32
    %c0_i32_0 = arith.constant 0 : i32
    %c0_i32_1 = arith.constant 0 : i32
    return %c0_i32, %c0_i32_0 : i32, i32
  }
  func.func @transform_5(%arg0: i32) -> (i32, i32) {
    %c0_i32 = arith.constant 0 : i32
    %c0_i32_0 = arith.constant 0 : i32
    return %arg0, %c0_i32 : i32, i32
  }
}

</mosaic_0001>

<bundles_post_ra>
// kernel: tpu_custom_call.1
= control target key start
LH: loop header
LB: loop body
LE: loop exit
PB: predicated region body
PF: predicated region fallthrough
CT: control target
= control target key end

     0   :  { %s287_s0 = inlined_call_operand.vmem [shape: f32[8,32], index: 0, kind: input, shape index: {}]   ;;  %s288_s1 = inlined_call_operand.vmem [shape: bf16[32,64], index: 1, kind: input, shape index: {}]   ;;  %s289_s2 = inlined_call_operand.vmem [shape: f32[1,64], index: 2, kind: input, shape index: {}]   ;;  %s290_s3 = inlined_call_operand.vmem [shape: bf16[64,16], index: 3, kind: input, shape index: {}]   ;;  %s291_s4 = inlined_call_operand.vmem [shape: f32[1,16], index: 4, kind: input, shape index: {}]   ;;  %s292_s5 = inlined_call_operand.hbm [shape: f32[8,16], index: 5, kind: output, shape index: {}]  }
   0x1   :  { %v185_v0 = vld [vmem:[%s288_s1 + $0x8] sm:$0xff]  ;;  %v184_v1 = vld [vmem:[%s288_s1] sm:$0xff]  ;;  %v189_v2 = vld [vmem:[%s290_s3 + $0x18] sm:$0xff] }
   0x2   :  { %54 = vmatpush.bf16.msra.mxu0 %v185_v0  ;;  %v22_v3 = vld [vmem:[%s287_s0] sm:$0xff] }
   0x3   :  { %10 = vsyncpa [#allocation3], 0  ;;  %107 = vmatpush.bf16.msra.mxu1 %v189_v2  ;;  %v188_v4 = vld [vmem:[%s290_s3 + $0x10] sm:$0xff]  ;;  %v23_v5 = vpack.c.bf16 %v22_v3, %v22_v3  ;;  %vm44_vm0 = vcmask 261120   ;;  %v187_v6 = vld [vmem:[%s290_s3 + $0x8] sm:$0xff]  ;;  %vm99_vm1 = vcmask 523264  }
   0x4   :  { %v186_v7 = vld [vmem:[%s290_s3] sm:$0xff]  ;;  %vm116_vm2 = vcmask 130048   ;;  %s149_s10 = sshll.u32 %s292_s5, 4  ;;  %s150_s10 = int_to_ptr.hbm [resolvable:$true] %s149_s10 }
   0x5   :  { %v191_v8 = vld [vmem:[%s289_s2] ss:$0 sm:$0xff]  ;;  %s223_s2 = smov [#allocation2]  }
   0x6   :  { %55 = vmatpush.bf16.msra.mxu0 %v184_v1  ;;  %v192_v14 = vld [vmem:[%s291_s4] ss:$0 sm:$0xff]  ;;  %s147_s3 = sshll.u32 %s223_s2, 4  ;;  %s148_s3 = int_to_ptr.vmem [resolvable:$true] %s147_s3 }
   0x7   :  { %108 = vmatpush.bf16.msra.mxu1 %v188_v4 }
   0x9   :  { %166 = vmatmul.msk.bf16.vlgmr.msra.gmra.mxu0 %vm44_vm0, %v23_v5 }
   0xb   :  { %109 = vmatpush.bf16.msra.mxu1 %v187_v6 }
   0xf   :  { %110 = vmatpush.bf16.msra.mxu1 %v186_v7 }
  0x86   :  { %v57_v9 = vpop.f32.mrf.mxu0 }
  0x87   :  { %v58_v10 = vadd.f32 %v191_v8, %v57_v9 }
  0x89   :  { %v61_v11 = vmax.f32 %v58_v10, 0.0 }
  0x8b   :  { %v62_v12 = vpack.c.bf16 %v61_v11, %v61_v11 }
  0x8d   :  { %183 = vmatmul.msk.bf16.vlgmr.msra.gmra.mxu1 %vm99_vm1, %v62_v12 }
  0x8e   :  { %v59_v13 = vpop.f32.mrf.mxu0 }
 0x10a   :  { %v112_v15 = vpop.f32.mrf.mxu1 }
 0x10b   :  { %v113_v16 = vadd.f32 %v192_v14, %v112_v15 }
 0x10d   :  { %v117_v17 = vsel %vm116_vm2, %v113_v16, -inf }
 0x10e   :  { %118 = vmax.xlane.f32.xlu0 %v117_v17 }
 0x112   :  { %v114_v18 = vpop.f32.mrf.mxu1 }
 0x181   :  { %v119_v19 = vpop.xlane.xlu0 %118 }
 0x182   :  { %v120_v20 = vsub.f32 %v113_v16, %v119_v19 }
 0x184   :  { %v121_v21 = vmul.f32 1.442695, %v120_v20 }
 0x186   :  { %193 = vpow2.f32 %v121_v21 }
 0x18c   :  { %v194_v22 = vpop.eup %193 }
 0x18d   :  { %v123_v23 = vsel %vm116_vm2, %v194_v22, 0.0 }
 0x18e   :  { %124 = vadd.xlane.f32.xlu0 %v123_v23 }
 0x201   :  { %v125_v24 = vpop.xlane.xlu0 %124 }
 0x202   :  { %195 = vrcp.f32 %v125_v24  ;;  %v137_v28 = vand.u32 2147483648, %v125_v24  ;;  %v135_v30 = vand.u32 2147483647, %v125_v24  ;;  %vm131_vm4 = vweird.f32 %v125_v24 }
 0x204   :  { %v138_v32 = vor.u32 1.1754944e-38, %v137_v28  ;;  %vm136_vm6 = vcmp.eq.f32.partialorder %v135_v30, 8.507059e+37 }
 0x208   :  { %v196_v25 = vpop.eup %195 }
 0x209   :  { %v127_v26 = vmul.f32 %v196_v25, %v125_v24  ;;  %vm132_vm3 = vweird.f32 %v196_v25 }
 0x20a   :  { %vm133_vm5 = vmor %vm131_vm4, %vm132_vm3 }
 0x20b   :  { %v128_v27 = vsub.f32 1.0, %v127_v26 }
 0x20d   :  { %v129_v29 = vmul.f32 %v196_v25, %v128_v27 }
 0x20f   :  { %v130_v31 = vadd.f32 %v196_v25, %v129_v29 }
 0x211   :  { %v134_v33 = vsel %vm133_vm5, %v196_v25, %v130_v31 }
 0x212   :  { %v139_v34 = vsel %vm136_vm6, %v138_v32, %v134_v33 }
 0x213   :  { %v140_v35 = vmul.f32 %v194_v22, %v139_v34 }
 0x215   :  { %141 = vst.msk [vmem:[#allocation2] sm:$0xff] %vm116_vm2, %v140_v35 }
 0x216   :  { %152 = dma.vmem_to_hbm [thread:$0]  %s148_s3, 128, %s150_s10, [#allocation3]  }
 0x217   :  { %221 = dma.done.wait [#allocation3], 128  }
 0x218   :  { %222 = vsyncadd [#allocation3], 4294967168 }
 0x219   :  { %157 = vsyncpa [#allocation3], 1 }

</bundles_post_ra>
